<compile_context>
chip_gen: v5e
topology: v5e:2x2
jax: 0.10.0
libtpu: 0.0.40
codegen_flags: <defaults>
</compile_context>

<pallas_src>
import functools

import jax
import jax.numpy as jnp
from jax import lax
from jax.experimental import pallas as pl
from jax.experimental.pallas import tpu as pltpu


# ------------------------------ fused kernel --------------------------------

def _fused_attention_kernel(xq_ref, xkv_ref, wq_ref, wkv_ref, wo_ref, bo_ref,
                            o_ref, *, num_heads, dim_head, compute_dtype):
    """One (batch, query-tile) grid step.

    xq_ref  : (1, tq, dim)   -- query rows for this tile
    xkv_ref : (1, T,  dim)   -- full sequence (for K/V)
    wq_ref  : (dim, H*Dh)    -- pre-transposed, head-contiguous, scale folded in
    wkv_ref : (dim, 2*H*Dh)  -- [Wk | Wv] fused, pre-transposed
    wo_ref  : (H*Dh, dim)    -- pre-transposed w_out
    bo_ref  : (1, dim)
    o_ref   : (1, tq, dim)
    """
    H, Dh = num_heads, dim_head
    wd = H * Dh
    cd = compute_dtype
    bf16_path = jnp.dtype(cd) == jnp.dtype(jnp.bfloat16)

    # Cast activations to the MXU compute dtype once per tile.
    xq = xq_ref[0].astype(cd)                        # (tq, dim)
    xkv = xkv_ref[0].astype(cd)                      # (T,  dim)
    tq = xq.shape[0]
    dim = o_ref.shape[-1]

    # Projections on the MXU (f32 accumulation). Scale is already folded into wq.
    q = jnp.dot(xq, wq_ref[...], preferred_element_type=jnp.float32)    # (tq, wd)
    kv = jnp.dot(xkv, wkv_ref[...], preferred_element_type=jnp.float32)  # (T, 2*wd)

    # Single cast of q / k / v back to the compute dtype for the attention dots.
    q_c = q.astype(cd)
    k_c = kv[:, :wd].astype(cd)
    v_c = kv[:, wd:].astype(cd)

    # Per-head attention (H is small & static -> unrolled).  The output
    # projection is accumulated per head; no concat, no merged buffer.
    # NOTE: Dh < 128 makes per-head slices sub-lane-width; for real shapes use
    # Dh >= 64 (ideally 128) or lane-aligned head groups.
    acc = jnp.zeros((tq, dim), jnp.float32)
    for h in range(H):
        qh = q_c[:, h * Dh:(h + 1) * Dh]             # (tq, Dh)
        kh = k_c[:, h * Dh:(h + 1) * Dh]             # (T,  Dh)
        vh = v_c[:, h * Dh:(h + 1) * Dh]             # (T,  Dh)

        # NT dot_general: contract last dims, no explicit transpose of kh.
        s = lax.dot_general(qh, kh, (((1,), (1,)), ((), ())),
                            preferred_element_type=jnp.float32)   # (tq, T), f32

        # Numerically stable softmax (f32).  approx reciprocal only on the
        # loose-accuracy bf16 path (EUP slot -> ~free); exact on f32 path.
        s = s - jnp.max(s, axis=-1, keepdims=True)
        p = jnp.exp(s)
        denom = jnp.sum(p, axis=-1, keepdims=True)
        p = p * pl.reciprocal(denom, approx=bf16_path)

        ho = jnp.dot(p.astype(cd), vh,
                     preferred_element_type=jnp.float32)          # (tq, Dh)
        acc = acc + jnp.dot(ho.astype(cd), wo_ref[h * Dh:(h + 1) * Dh, :],
                            preferred_element_type=jnp.float32)   # (tq, dim)

    o_ref[0] = (acc + bo_ref[...]).astype(o_ref.dtype)


# -------------------------------- wrapper ------------------------------------

def attention_forward(x, w_qkv, w_out, b_out, *, num_heads, dim_head,
                      compute_dtype=jnp.bfloat16):
    """Pallas implementation of Attention.forward (discriminator=False path).

    x      : (B, T, dim)
    w_qkv  : (3 * num_heads * dim_head, dim)   -- nn.Linear weight (out, in), no bias
    w_out  : (dim, num_heads * dim_head)       -- nn.Linear weight (out, in)
    b_out  : (dim,)
    """
    B, T, dim = x.shape
    H, Dh = num_heads, dim_head
    wd = H * Dh
    scale = float(dim) ** (-0.5)   # matches the module: dim**-0.5 (not dim_head**-0.5)

    # Query-tile size: 128 when it divides T (lane/sublane friendly), else whole T.
    tq = 128 if (T % 128 == 0) else T
    n_q = T // tq

    # One-time weight re-layout (would live at module init in a real model):
    # the module packs the to_qkv output axis as '(d k h)' (h fastest); reorder
    # rows to '(k h d)' and transpose so q/k/v land head-contiguous and the
    # merged 'b t (h d)' order matches w_out's input axis.  Scale is folded
    # into wq; K and V weights are fused into one wide matrix; everything is
    # cast to the MXU compute dtype once here.
    w_r = w_qkv.reshape(Dh, 3, H, dim)                  # (d, k, h, dim)
    w_r = jnp.transpose(w_r, (1, 2, 0, 3))              # (k, h, d, dim)
    wq = (jnp.transpose(w_r[0].reshape(wd, dim)) * scale).astype(compute_dtype)
    wk = jnp.transpose(w_r[1].reshape(wd, dim))
    wv = jnp.transpose(w_r[2].reshape(wd, dim))
    wkv = jnp.concatenate([wk, wv], axis=1).astype(compute_dtype)   # (dim, 2*wd)
    wo = jnp.transpose(w_out).astype(compute_dtype)                 # (wd, dim)
    bo = b_out.reshape(1, dim).astype(jnp.float32)

    # Explicit VMEM budget (headroom over a rough live-bytes estimate, clamped
    # so it is safe on v5e/v6e (128 MiB) and v7x (64 MiB physical)).
    cbytes = jnp.dtype(compute_dtype).itemsize
    xbytes = jnp.dtype(x.dtype).itemsize
    est = (
        (dim * wd + dim * 2 * wd + wd * dim) * cbytes + dim * 4      # weights
        + 2 * (tq * dim + T * dim) * xbytes                          # x tiles (dbl buf)
        + 2 * tq * dim * xbytes                                      # out tile (dbl buf)
        + (tq * wd + T * 2 * wd) * (4 + cbytes)                      # q / kv (+casts)
        + 3 * tq * T * 4                                             # scores / probs
        + tq * dim * 4                                               # accumulator
    )
    vmem_limit = int(min(64 * 1024 * 1024, max(16 * 1024 * 1024, 2 * est)))

    kernel = functools.partial(
        _fused_attention_kernel,
        num_heads=H, dim_head=Dh, compute_dtype=compute_dtype)

    return pl.pallas_call(
        kernel,
        out_shape=jax.ShapeDtypeStruct((B, T, dim), x.dtype),
        grid=(B, n_q),
        in_specs=[
            pl.BlockSpec((1, tq, dim), lambda b, qi: (b, qi, 0)),  # x (query tile)
            pl.BlockSpec((1, T, dim), lambda b, qi: (b, 0, 0)),    # x (full, for K/V)
            pl.BlockSpec((dim, wd), lambda b, qi: (0, 0)),         # wq (resident)
            pl.BlockSpec((dim, 2 * wd), lambda b, qi: (0, 0)),     # wk|wv fused
            pl.BlockSpec((wd, dim), lambda b, qi: (0, 0)),         # wo
            pl.BlockSpec((1, dim), lambda b, qi: (0, 0)),          # b_out
        ],
        out_specs=pl.BlockSpec((1, tq, dim), lambda b, qi: (b, qi, 0)),
        compiler_params=pltpu.CompilerParams(
            dimension_semantics=("parallel", "parallel"),
            vmem_limit_bytes=vmem_limit),
    )(x, x, wq, wkv, wo, bo)


# ---------------------------- pure-JAX reference -----------------------------

def attention_reference(x, w_qkv, w_out, b_out, *, num_heads, dim_head):
    # Faithful transcription of the torch module (einops 'b t (d k h) -> k b h t d').
    B, T, dim = x.shape
    H, Dh = num_heads, dim_head
    qkv = x @ w_qkv.T
    qkv = qkv.reshape(B, T, Dh, 3, H)
    qkv = jnp.transpose(qkv, (3, 0, 4, 1, 2))          # (k, b, h, t, d)
    q, k, v = qkv[0], qkv[1], qkv[2]
    attn = jnp.einsum('bhid,bhjd->bhij', q, k) * (float(dim) ** -0.5)
    p = jax.nn.softmax(attn, axis=-1)
    res = jnp.einsum('bhij,bhjd->bhid', p, v)
    res = jnp.transpose(res, (0, 2, 1, 3)).reshape(B, T, H * Dh)
    return res @ w_out.T + b_out


# --------------------------------- main --------------------------------------

if __name__ == "__main__":
    B, T, dim = 2, 8, 32
    num_heads = 4
    dim_head = dim // num_heads        # 8
    weight_dim = num_heads * dim_head  # 32

    key = jax.random.PRNGKey(0)
    kx, kw1, kw2, kb = jax.random.split(key, 4)
    x = jax.random.normal(kx, (B, T, dim), dtype=jnp.float32)
    w_qkv = jax.random.normal(kw1, (3 * weight_dim, dim), dtype=jnp.float32) * 0.1
    w_out = jax.random.normal(kw2, (dim, weight_dim), dtype=jnp.float32) * 0.1
    b_out = jax.random.normal(kb, (dim,), dtype=jnp.float32) * 0.1

    y_ref = attention_reference(x, w_qkv, w_out, b_out,
                                num_heads=num_heads, dim_head=dim_head)

    # Default (perf) path: bf16 MXU operands, loose tolerance.
    y_bf16 = attention_forward(x, w_qkv, w_out, b_out,
                               num_heads=num_heads, dim_head=dim_head,
                               compute_dtype=jnp.bfloat16)
    y_bf16 = jax.block_until_ready(y_bf16)
    assert y_bf16.shape == (B, T, dim)
    assert jnp.allclose(y_bf16, y_ref, atol=3e-2, rtol=3e-2), "bf16 path mismatch"

    # Accuracy path: f32 MXU operands, tight tolerance.
    y_f32 = attention_forward(x, w_qkv, w_out, b_out,
                              num_heads=num_heads, dim_head=dim_head,
                              compute_dtype=jnp.float32)
    y_f32 = jax.block_until_ready(y_f32)
    assert jnp.allclose(y_f32, y_ref, atol=1e-5, rtol=1e-5), "f32 path mismatch"

    print("KERNEL_OK")
</pallas_src>

<mosaic_0001>
module attributes {stable_mosaic.version = 11 : i64} {
  func.func @_fused_attention_kernel(%arg0: i32, %arg1: i32, %arg2: memref<1x8x32xf32, #tpu.memory_space<vmem>>, %arg3: memref<1x8x32xf32, #tpu.memory_space<vmem>>, %arg4: memref<32x32xbf16, #tpu.memory_space<vmem>>, %arg5: memref<32x64xbf16, #tpu.memory_space<vmem>>, %arg6: memref<32x32xbf16, #tpu.memory_space<vmem>>, %arg7: memref<1x32xf32, #tpu.memory_space<vmem>>, %arg8: memref<1x8x32xf32, #tpu.memory_space<vmem>>) attributes {dimension_semantics = [#tpu.dimension_semantics<parallel>, #tpu.dimension_semantics<parallel>], iteration_bounds = array<i64: 2, 1>, scalar_prefetch = 0 : i64, scratch_operands = 0 : i64, tpu.core_type = #tpu.core_type<tc>, window_params = [{transform_indices = @transform_0, window_bounds = array<i64: 1, 8, 32>}, {transform_indices = @transform_1, window_bounds = array<i64: 1, 8, 32>}, {pipeline_mode = #tpu.pipeline_mode<synchronous>, transform_indices = @transform_2, window_bounds = array<i64: 32, 32>}, {pipeline_mode = #tpu.pipeline_mode<synchronous>, transform_indices = @transform_3, window_bounds = array<i64: 32, 64>}, {pipeline_mode = #tpu.pipeline_mode<synchronous>, transform_indices = @transform_4, window_bounds = array<i64: 32, 32>}, {pipeline_mode = #tpu.pipeline_mode<synchronous>, transform_indices = @transform_5, window_bounds = array<i64: 1, 32>}, {transform_indices = @transform_6, window_bounds = array<i64: 1, 8, 32>}]} {
    %c0 = arith.constant 0 : index
    %c0_0 = arith.constant 0 : index
    %c0_1 = arith.constant 0 : index
    %0 = vector.load %arg2[%c0, %c0_0, %c0_1] : memref<1x8x32xf32, #tpu.memory_space<vmem>>, vector<1x8x32xf32>
    %1 = vector.shape_cast %0 : vector<1x8x32xf32> to vector<8x32xf32>
    %2 = arith.truncf %1 : vector<8x32xf32> to vector<8x32xbf16>
    %c0_2 = arith.constant 0 : index
    %c0_3 = arith.constant 0 : index
    %c0_4 = arith.constant 0 : index
    %3 = vector.load %arg3[%c0_2, %c0_3, %c0_4] : memref<1x8x32xf32, #tpu.memory_space<vmem>>, vector<1x8x32xf32>
    %4 = vector.shape_cast %3 : vector<1x8x32xf32> to vector<8x32xf32>
    %5 = arith.truncf %4 : vector<8x32xf32> to vector<8x32xbf16>
    %c0_5 = arith.constant 0 : index
    %c0_6 = arith.constant 0 : index
    %6 = vector.load %arg4[%c0_5, %c0_6] : memref<32x32xbf16, #tpu.memory_space<vmem>>, vector<32x32xbf16>
    %cst = arith.constant dense<0.000000e+00> : vector<8x32xf32>
    %7 = tpu.matmul %2, %6, %cst {dimension_numbers = #tpu.dot_dimension_numbers<[1], [0], [0], [1], [0, 0, 1, 1], [], []>} : vector<8x32xbf16>, vector<32x32xbf16>, vector<8x32xf32> -> vector<8x32xf32>
    %c0_7 = arith.constant 0 : index
    %c0_8 = arith.constant 0 : index
    %8 = vector.load %arg5[%c0_7, %c0_8] : memref<32x64xbf16, #tpu.memory_space<vmem>>, vector<32x64xbf16>
    %cst_9 = arith.constant dense<0.000000e+00> : vector<8x64xf32>
    %9 = tpu.matmul %5, %8, %cst_9 {dimension_numbers = #tpu.dot_dimension_numbers<[1], [0], [0], [1], [0, 0, 1, 1], [], []>} : vector<8x32xbf16>, vector<32x64xbf16>, vector<8x64xf32> -> vector<8x64xf32>
    %10 = arith.truncf %7 : vector<8x32xf32> to vector<8x32xbf16>
    %11 = vector.extract_strided_slice %9 {offsets = [0, 0], sizes = [8, 32], strides = [1, 1]} : vector<8x64xf32> to vector<8x32xf32>
    %12 = arith.truncf %11 : vector<8x32xf32> to vector<8x32xbf16>
    %13 = vector.extract_strided_slice %9 {offsets = [0, 32], sizes = [8, 32], strides = [1, 1]} : vector<8x64xf32> to vector<8x32xf32>
    %14 = arith.truncf %13 : vector<8x32xf32> to vector<8x32xbf16>
    %cst_10 = arith.constant 0.000000e+00 : f32
    %15 = vector.broadcast %cst_10 : f32 to vector<8x32xf32>
    %16 = vector.extract_strided_slice %10 {offsets = [0, 0], sizes = [8, 8], strides = [1, 1]} : vector<8x32xbf16> to vector<8x8xbf16>
    %17 = vector.extract_strided_slice %12 {offsets = [0, 0], sizes = [8, 8], strides = [1, 1]} : vector<8x32xbf16> to vector<8x8xbf16>
    %18 = vector.extract_strided_slice %14 {offsets = [0, 0], sizes = [8, 8], strides = [1, 1]} : vector<8x32xbf16> to vector<8x8xbf16>
    %cst_11 = arith.constant dense<0.000000e+00> : vector<8x8xf32>
    %19 = tpu.matmul %16, %17, %cst_11 {dimension_numbers = #tpu.dot_dimension_numbers<[1], [1], [0], [0], [0, 0, 1, 0], [], []>} : vector<8x8xbf16>, vector<8x8xbf16>, vector<8x8xf32> -> vector<8x8xf32>
    %cst_12 = arith.constant dense<0xFF800000> : vector<8xf32>
    %20 = vector.multi_reduction <maximumf>, %19, %cst_12 [1] : vector<8x8xf32> to vector<8xf32>
    %21 = vector.shape_cast %20 : vector<8xf32> to vector<8x1xf32>
    %22 = vector.broadcast %21 : vector<8x1xf32> to vector<8x8xf32>
    %23 = arith.subf %19, %22 : vector<8x8xf32>
    %24 = math.exp %23 : vector<8x8xf32>
    %cst_13 = arith.constant dense<0.000000e+00> : vector<8xf32>
    %25 = vector.multi_reduction <add>, %24, %cst_13 [1] : vector<8x8xf32> to vector<8xf32>
    %26 = vector.shape_cast %25 : vector<8xf32> to vector<8x1xf32>
    %27 = tpu.reciprocal %26 {approx = true} : vector<8x1xf32> -> vector<8x1xf32>
    %28 = vector.broadcast %27 : vector<8x1xf32> to vector<8x8xf32>
    %29 = arith.mulf %24, %28 : vector<8x8xf32>
    %30 = arith.truncf %29 : vector<8x8xf32> to vector<8x8xbf16>
    %cst_14 = arith.constant dense<0.000000e+00> : vector<8x8xf32>
    %31 = tpu.matmul %30, %18, %cst_14 {dimension_numbers = #tpu.dot_dimension_numbers<[1], [0], [0], [1], [0, 0, 1, 1], [], []>} : vector<8x8xbf16>, vector<8x8xbf16>, vector<8x8xf32> -> vector<8x8xf32>
    %32 = arith.truncf %31 : vector<8x8xf32> to vector<8x8xbf16>
    %c0_15 = arith.constant 0 : index
    %c0_16 = arith.constant 0 : index
    %33 = vector.load %arg6[%c0_15, %c0_16] : memref<32x32xbf16, #tpu.memory_space<vmem>>, vector<8x32xbf16>
    %cst_17 = arith.constant dense<0.000000e+00> : vector<8x32xf32>
    %34 = tpu.matmul %32, %33, %cst_17 {dimension_numbers = #tpu.dot_dimension_numbers<[1], [0], [0], [1], [0, 0, 1, 1], [], []>} : vector<8x8xbf16>, vector<8x32xbf16>, vector<8x32xf32> -> vector<8x32xf32>
    %35 = arith.addf %15, %34 : vector<8x32xf32>
    %36 = vector.extract_strided_slice %10 {offsets = [0, 8], sizes = [8, 8], strides = [1, 1]} : vector<8x32xbf16> to vector<8x8xbf16>
    %37 = vector.extract_strided_slice %12 {offsets = [0, 8], sizes = [8, 8], strides = [1, 1]} : vector<8x32xbf16> to vector<8x8xbf16>
    %38 = vector.extract_strided_slice %14 {offsets = [0, 8], sizes = [8, 8], strides = [1, 1]} : vector<8x32xbf16> to vector<8x8xbf16>
    %cst_18 = arith.constant dense<0.000000e+00> : vector<8x8xf32>
    %39 = tpu.matmul %36, %37, %cst_18 {dimension_numbers = #tpu.dot_dimension_numbers<[1], [1], [0], [0], [0, 0, 1, 0], [], []>} : vector<8x8xbf16>, vector<8x8xbf16>, vector<8x8xf32> -> vector<8x8xf32>
    %cst_19 = arith.constant dense<0xFF800000> : vector<8xf32>
    %40 = vector.multi_reduction <maximumf>, %39, %cst_19 [1] : vector<8x8xf32> to vector<8xf32>
    %41 = vector.shape_cast %40 : vector<8xf32> to vector<8x1xf32>
    %42 = vector.broadcast %41 : vector<8x1xf32> to vector<8x8xf32>
    %43 = arith.subf %39, %42 : vector<8x8xf32>
    %44 = math.exp %43 : vector<8x8xf32>
    %cst_20 = arith.constant dense<0.000000e+00> : vector<8xf32>
    %45 = vector.multi_reduction <add>, %44, %cst_20 [1] : vector<8x8xf32> to vector<8xf32>
    %46 = vector.shape_cast %45 : vector<8xf32> to vector<8x1xf32>
    %47 = tpu.reciprocal %46 {approx = true} : vector<8x1xf32> -> vector<8x1xf32>
    %48 = vector.broadcast %47 : vector<8x1xf32> to vector<8x8xf32>
    %49 = arith.mulf %44, %48 : vector<8x8xf32>
    %50 = arith.truncf %49 : vector<8x8xf32> to vector<8x8xbf16>
    %cst_21 = arith.constant dense<0.000000e+00> : vector<8x8xf32>
    %51 = tpu.matmul %50, %38, %cst_21 {dimension_numbers = #tpu.dot_dimension_numbers<[1], [0], [0], [1], [0, 0, 1, 1], [], []>} : vector<8x8xbf16>, vector<8x8xbf16>, vector<8x8xf32> -> vector<8x8xf32>
    %52 = arith.truncf %51 : vector<8x8xf32> to vector<8x8xbf16>
    %c8 = arith.constant 8 : index
    %c0_22 = arith.constant 0 : index
    %53 = vector.load %arg6[%c8, %c0_22] : memref<32x32xbf16, #tpu.memory_space<vmem>>, vector<8x32xbf16>
    %cst_23 = arith.constant dense<0.000000e+00> : vector<8x32xf32>
    %54 = tpu.matmul %52, %53, %cst_23 {dimension_numbers = #tpu.dot_dimension_numbers<[1], [0], [0], [1], [0, 0, 1, 1], [], []>} : vector<8x8xbf16>, vector<8x32xbf16>, vector<8x32xf32> -> vector<8x32xf32>
    %55 = arith.addf %35, %54 : vector<8x32xf32>
    %56 = vector.extract_strided_slice %10 {offsets = [0, 16], sizes = [8, 8], strides = [1, 1]} : vector<8x32xbf16> to vector<8x8xbf16>
    %57 = vector.extract_strided_slice %12 {offsets = [0, 16], sizes = [8, 8], strides = [1, 1]} : vector<8x32xbf16> to vector<8x8xbf16>
    %58 = vector.extract_strided_slice %14 {offsets = [0, 16], sizes = [8, 8], strides = [1, 1]} : vector<8x32xbf16> to vector<8x8xbf16>
    %cst_24 = arith.constant dense<0.000000e+00> : vector<8x8xf32>
    %59 = tpu.matmul %56, %57, %cst_24 {dimension_numbers = #tpu.dot_dimension_numbers<[1], [1], [0], [0], [0, 0, 1, 0], [], []>} : vector<8x8xbf16>, vector<8x8xbf16>, vector<8x8xf32> -> vector<8x8xf32>
    %cst_25 = arith.constant dense<0xFF800000> : vector<8xf32>
    %60 = vector.multi_reduction <maximumf>, %59, %cst_25 [1] : vector<8x8xf32> to vector<8xf32>
    %61 = vector.shape_cast %60 : vector<8xf32> to vector<8x1xf32>
    %62 = vector.broadcast %61 : vector<8x1xf32> to vector<8x8xf32>
    %63 = arith.subf %59, %62 : vector<8x8xf32>
    %64 = math.exp %63 : vector<8x8xf32>
    %cst_26 = arith.constant dense<0.000000e+00> : vector<8xf32>
    %65 = vector.multi_reduction <add>, %64, %cst_26 [1] : vector<8x8xf32> to vector<8xf32>
    %66 = vector.shape_cast %65 : vector<8xf32> to vector<8x1xf32>
    %67 = tpu.reciprocal %66 {approx = true} : vector<8x1xf32> -> vector<8x1xf32>
    %68 = vector.broadcast %67 : vector<8x1xf32> to vector<8x8xf32>
    %69 = arith.mulf %64, %68 : vector<8x8xf32>
    %70 = arith.truncf %69 : vector<8x8xf32> to vector<8x8xbf16>
    %cst_27 = arith.constant dense<0.000000e+00> : vector<8x8xf32>
    %71 = tpu.matmul %70, %58, %cst_27 {dimension_numbers = #tpu.dot_dimension_numbers<[1], [0], [0], [1], [0, 0, 1, 1], [], []>} : vector<8x8xbf16>, vector<8x8xbf16>, vector<8x8xf32> -> vector<8x8xf32>
    %72 = arith.truncf %71 : vector<8x8xf32> to vector<8x8xbf16>
    %c16 = arith.constant 16 : index
    %c0_28 = arith.constant 0 : index
    %73 = vector.load %arg6[%c16, %c0_28] : memref<32x32xbf16, #tpu.memory_space<vmem>>, vector<8x32xbf16>
    %cst_29 = arith.constant dense<0.000000e+00> : vector<8x32xf32>
    %74 = tpu.matmul %72, %73, %cst_29 {dimension_numbers = #tpu.dot_dimension_numbers<[1], [0], [0], [1], [0, 0, 1, 1], [], []>} : vector<8x8xbf16>, vector<8x32xbf16>, vector<8x32xf32> -> vector<8x32xf32>
    %75 = arith.addf %55, %74 : vector<8x32xf32>
    %76 = vector.extract_strided_slice %10 {offsets = [0, 24], sizes = [8, 8], strides = [1, 1]} : vector<8x32xbf16> to vector<8x8xbf16>
    %77 = vector.extract_strided_slice %12 {offsets = [0, 24], sizes = [8, 8], strides = [1, 1]} : vector<8x32xbf16> to vector<8x8xbf16>
    %78 = vector.extract_strided_slice %14 {offsets = [0, 24], sizes = [8, 8], strides = [1, 1]} : vector<8x32xbf16> to vector<8x8xbf16>
    %cst_30 = arith.constant dense<0.000000e+00> : vector<8x8xf32>
    %79 = tpu.matmul %76, %77, %cst_30 {dimension_numbers = #tpu.dot_dimension_numbers<[1], [1], [0], [0], [0, 0, 1, 0], [], []>} : vector<8x8xbf16>, vector<8x8xbf16>, vector<8x8xf32> -> vector<8x8xf32>
    %cst_31 = arith.constant dense<0xFF800000> : vector<8xf32>
    %80 = vector.multi_reduction <maximumf>, %79, %cst_31 [1] : vector<8x8xf32> to vector<8xf32>
    %81 = vector.shape_cast %80 : vector<8xf32> to vector<8x1xf32>
    %82 = vector.broadcast %81 : vector<8x1xf32> to vector<8x8xf32>
    %83 = arith.subf %79, %82 : vector<8x8xf32>
    %84 = math.exp %83 : vector<8x8xf32>
    %cst_32 = arith.constant dense<0.000000e+00> : vector<8xf32>
    %85 = vector.multi_reduction <add>, %84, %cst_32 [1] : vector<8x8xf32> to vector<8xf32>
    %86 = vector.shape_cast %85 : vector<8xf32> to vector<8x1xf32>
    %87 = tpu.reciprocal %86 {approx = true} : vector<8x1xf32> -> vector<8x1xf32>
    %88 = vector.broadcast %87 : vector<8x1xf32> to vector<8x8xf32>
    %89 = arith.mulf %84, %88 : vector<8x8xf32>
    %90 = arith.truncf %89 : vector<8x8xf32> to vector<8x8xbf16>
    %cst_33 = arith.constant dense<0.000000e+00> : vector<8x8xf32>
    %91 = tpu.matmul %90, %78, %cst_33 {dimension_numbers = #tpu.dot_dimension_numbers<[1], [0], [0], [1], [0, 0, 1, 1], [], []>} : vector<8x8xbf16>, vector<8x8xbf16>, vector<8x8xf32> -> vector<8x8xf32>
    %92 = arith.truncf %91 : vector<8x8xf32> to vector<8x8xbf16>
    %c24 = arith.constant 24 : index
    %c0_34 = arith.constant 0 : index
    %93 = vector.load %arg6[%c24, %c0_34] : memref<32x32xbf16, #tpu.memory_space<vmem>>, vector<8x32xbf16>
    %cst_35 = arith.constant dense<0.000000e+00> : vector<8x32xf32>
    %94 = tpu.matmul %92, %93, %cst_35 {dimension_numbers = #tpu.dot_dimension_numbers<[1], [0], [0], [1], [0, 0, 1, 1], [], []>} : vector<8x8xbf16>, vector<8x32xbf16>, vector<8x32xf32> -> vector<8x32xf32>
    %95 = arith.addf %75, %94 : vector<8x32xf32>
    %c0_36 = arith.constant 0 : index
    %c0_37 = arith.constant 0 : index
    %96 = vector.load %arg7[%c0_36, %c0_37] : memref<1x32xf32, #tpu.memory_space<vmem>>, vector<1x32xf32>
    %97 = vector.broadcast %96 : vector<1x32xf32> to vector<8x32xf32>
    %98 = arith.addf %95, %97 : vector<8x32xf32>
    %c0_38 = arith.constant 0 : index
    %c0_39 = arith.constant 0 : index
    %c0_40 = arith.constant 0 : index
    %99 = vector.load %arg8[%c0_38, %c0_39, %c0_40] : memref<1x8x32xf32, #tpu.memory_space<vmem>>, vector<1x8x32xf32>
    %100 = vector.shape_cast %99 : vector<1x8x32xf32> to vector<8x32xf32>
    %101 = vector.shape_cast %98 : vector<8x32xf32> to vector<1x8x32xf32>
    tpu.vector_store %arg8[%c0_38, %c0_39, %c0_40], %101 {strides = array<i32>} : memref<1x8x32xf32, #tpu.memory_space<vmem>>, vector<1x8x32xf32>,
    return
  }
  func.func @transform_0(%arg0: i32, %arg1: i32) -> (i32, i32, i32) {
    %c0_i32 = arith.constant 0 : i32
    %c0_i32_0 = arith.constant 0 : i32
    return %arg0, %arg1, %c0_i32 : i32, i32, i32
  }
  func.func @transform_1(%arg0: i32, %arg1: i32) -> (i32, i32, i32) {
    %c0_i32 = arith.constant 0 : i32
    %c0_i32_0 = arith.constant 0 : i32
    %c0_i32_1 = arith.constant 0 : i32
    return %arg0, %c0_i32, %c0_i32_0 : i32, i32, i32
  }
  func.func @transform_2(%arg0: i32, %arg1: i32) -> (i32, i32) {
    %c0_i32 = arith.constant 0 : i32
    %c0_i32_0 = arith.constant 0 : i32
    %c0_i32_1 = arith.constant 0 : i32
    return %c0_i32, %c0_i32_0 : i32, i32
  }
  func.func @transform_3(%arg0: i32, %arg1: i32) -> (i32, i32) {
    %c0_i32 = arith.constant 0 : i32
    %c0_i32_0 = arith.constant 0 : i32
    %c0_i32_1 = arith.constant 0 : i32
    return %c0_i32, %c0_i32_0 : i32, i32
  }
  func.func @transform_4(%arg0: i32, %arg1: i32) -> (i32, i32) {
    %c0_i32 = arith.constant 0 : i32
    %c0_i32_0 = arith.constant 0 : i32
    %c0_i32_1 = arith.constant 0 : i32
    return %c0_i32, %c0_i32_0 : i32, i32
  }
  func.func @transform_5(%arg0: i32, %arg1: i32) -> (i32, i32) {
    %c0_i32 = arith.constant 0 : i32
    %c0_i32_0 = arith.constant 0 : i32
    %c0_i32_1 = arith.constant 0 : i32
    return %c0_i32, %c0_i32_0 : i32, i32
  }
  func.func @transform_6(%arg0: i32, %arg1: i32) -> (i32, i32, i32) {
    %c0_i32 = arith.constant 0 : i32
    %c0_i32_0 = arith.constant 0 : i32
    return %arg0, %arg1, %c0_i32 : i32, i32, i32
  }
}

</mosaic_0001>

<bundles_post_ra>
// kernel: tpu_custom_call.1
= control target key start
LH: loop header
LB: loop body
LE: loop exit
PB: predicated region body
PF: predicated region fallthrough
CT: control target
= control target key end

     0   :  { %s1614_s0 = inlined_call_operand.hbm [shape: f32[2,8,32], index: 0, kind: input, shape index: {}]   ;;  %s1615_s1 = inlined_call_operand.hbm [shape: f32[2,8,32], index: 1, kind: input, shape index: {}]   ;;  %s1616_s2 = inlined_call_operand.hbm [shape: bf16[32,32], index: 2, kind: input, shape index: {}]   ;;  %s1617_s3 = inlined_call_operand.hbm [shape: bf16[32,64], index: 3, kind: input, shape index: {}]   ;;  %s1618_s4 = inlined_call_operand.hbm [shape: bf16[32,32], index: 4, kind: input, shape index: {}]   ;;  %s1619_s5 = inlined_call_operand.vmem [shape: f32[1,32], index: 5, kind: input, shape index: {}]   ;;  %s1620_s6 = inlined_call_operand.hbm [shape: f32[2,8,32], index: 6, kind: output, shape index: {}]  }
   0x1   :  { %1624 = sst [smem:[#allocation21_spill]] %s1616_s2 }
   0x2   :  { %1625 = sst [smem:[#allocation22_spill]] %s1617_s3 }
   0x3   :  { %1626 = sst [smem:[#allocation23_spill]] %s1618_s4 }
   0x4   :  { %11 = vsyncpa [#allocation3], 0 }
   0x5   :  { %13 = vsyncpa [#allocation3 + $0x1], 0 }
   0x6   :  { %14 = vsyncpa [#allocation6], 0 }
   0x7   :  { %16 = vsyncpa [#allocation6 + $0x1], 0 }
   0x8   :  { %17 = vsyncpa [#allocation9], 0 }
   0x9   :  { %18 = vsyncpa [#allocation4], 0 }
   0xa   :  { %20 = vsyncpa [#allocation4 + $0x1], 0  ;;  %s1387_s21 = smov 0   ;;  %s1389_s22 = smov 0  }
   0xb   :  { %s1391_s23 = smov 0   ;;  %s1393_s24 = smov 0  }
   0xc   :  { %s1395_s25 = smov 0   ;;  %s1397_s26 = smov 0  }
   0xd LB: > { %1627 = sst [smem:[#allocation17_spill]] %s1326_s23  ;;  %s1418_s27 = sadd.s32 4294967295, %s1338_s26   ;;  %s1338_s26 = sphi %s1397_s26, %s26_s26   ;;  %s1334_s25 = sphi %s1395_s25, %s1643_s25   ;;  %s1330_s24 = sphi %s1393_s24, %s1642_s24   ;;  %s1326_s23 = sphi %s1391_s23, %s1641_s23   ;;  %s1322_s22 = sphi %s1389_s22, %s1645_s22   ;;  %s1318_s21 = sphi %s1387_s21, %s1644_s21  }
   0xe   : > { %1628 = sst [smem:[#allocation18_spill]] %s1334_s25  ;;  %p916_p0 = scmp.ge.s32.totalorder %s1338_s26, 1 }
   0xf   : > { %p61_p1 = scmp.eq.s32.totalorder %s1418_s27, 0  ;;  %p209_p2 = scmp.lt.s32.totalorder %s1338_s26, 3 }
  0x10   : > { %s1629_s2 = sld [smem:[#allocation21_spill]]  ;;  %s1340_s8 = smov [#allocation7]  }
  0x11   : > { %p1426_p3 = pnand %p916_p0, %p209_p2  ;;  %s222_s9 = sshll.u32 %s1340_s8, 4  ;;  %s223_s9 = int_to_ptr.vmem [resolvable:$true] %s222_s9 }
  0x12   : > { %p920_p6 = scmp.ge.s32.totalorder %s1338_s26, 2  ;;  %s1632_s3 = sld [smem:[#allocation22_spill]] }
  0x13   : > { %p988_p4 = pneg %p1426_p3  ;;  %s1341_s14 = smov 64  }
  0x14   : > { %s1342_s15 = smov 4   ;;  %s1343_s16 = smov [#allocation8]  }
  0x15   : > { %p1434_p5 = pnand %p988_p4, %p61_p1  ;;  %s236_s17 = sshll.u32 %s1343_s16, 4  ;;  %s237_s17 = int_to_ptr.vmem [resolvable:$true] %s236_s17 }
  0x16   : > { %s220_s30 = sshll.u32 %s1629_s2, 4  ;;  %s1633_s4 = sld [smem:[#allocation23_spill]]  ;;  %s221_s30 = int_to_ptr.hbm [resolvable:$true] %s220_s30 }
  0x17   : > { %991 = dma.hbm_to_vmem [thread:$0]  (!%p1434_p5), %s221_s30, 256, %s223_s9, [#allocation6], %s1341_s14, %s1341_s14, %s1342_s15  }
  0x18   : > { %s234_s13 = sshll.u32 %s1632_s3, 4  ;;  %s1344_s28 = smov [#allocation10]   ;;  %s235_s13 = int_to_ptr.hbm [resolvable:$true] %s234_s13 }
  0x19   : > { %994 = dma.hbm_to_vmem [thread:$0]  (!%p1434_p5), %s235_s13, 256, %s237_s17, [#allocation9], %s1341_s14, %s1341_s14, %s1342_s15  }
  0x1a   : > { %s250_s29 = sshll.u32 %s1344_s28, 4  ;;  %s915_s30 = sadd.s32 4294967294, %s1338_s26   ;;  %s251_s29 = int_to_ptr.vmem [resolvable:$true] %s250_s29 }
  0x1b   : > { %s38_s8 = sadd.s32 1, %s1334_s25  ;;  %s47_s9 = sadd.s32 1, %s1326_s23 }
  0x1c   : > { %s248_s20 = sshll.u32 %s1633_s4, 4  ;;  %p40_p7 = scmp.ge.s32.totalorder %s38_s8, 2  ;;  %s249_s20 = int_to_ptr.hbm [resolvable:$true] %s248_s20 }
  0x1d   : > { %997 = dma.hbm_to_vmem [thread:$0]  (!%p1434_p5), %s249_s20, 256, %s251_s29, [#allocation9], %s1341_s14, %s1341_s14, %s1342_s15  }
  0x1e   : > { %p54_p8 = scmp.ne.s32.totalorder %s1326_s23, %s1322_s22  ;;  %p55_p9 = scmp.eq.s32.totalorder %s1338_s26, 0 }
  0x1f   : > { %p60_p10 = scmp.ne.s32.totalorder %s1322_s22, %s1318_s21  ;;  %s1647_s8 = smov (%p40_p7, %s38_s8), 0 }
  0x20   : > { %1634 = sst [smem:[#allocation19_spill]] %s1647_s8  ;;  %p1461_p11 = por %p55_p9, %p54_p8 }
  0x21   : > { %p1467_p12 = por %p61_p1, %p60_p10  ;;  %s42_s12 = ssub.s32 %s1334_s25, %s1647_s8 }
  0x22   : > { %p196_p13 = scmp.eq.s32.totalorder %s1418_s27, 1  ;;  %p45_p0 = scmp.eq.s32.totalorder %s42_s12, 0 }
  0x23   : > { %p202_p2 = scmp.eq.s32.totalorder %s915_s30, 1  ;;  %p1012_p5 = scmp.lt.s32.totalorder %s1338_s26, 2 }
  0x24   : > { %p1474_p4 = por %p196_p13, %p54_p8  ;;  %s267_s16 = sand.u32 1, %s1326_s23  }
  0x25   : > { %s1480_s14 = scalar_select %p45_p0, %s1326_s23, %s47_s9  }
  0x26   : > { %p1482_p7 = por %p202_p2, %p60_p10  ;;  %s921_s17 = sshll.u32 %s267_s16, 3 }
  0x27   : > { %1638 = sst [smem:[#allocation20_spill]] %s1480_s14  ;;  %s922_s18 = sshll.u32 %s1334_s25, 3 }
  0x28   : > { %s276_s28 = scalar_lea.hbm %s1614_s0, %s922_s18  ;;  %s271_s29 = scalar_lea.vmem [#allocation2], %s921_s17 }
  0x29   : > { %s280_s30 = sshll.u32 %s271_s29, 4  ;;  %s278_s12 = sshll.u32 %s276_s28, 4  ;;  %s281_s30 = int_to_ptr.vmem [resolvable:$true] %s280_s30  ;;  %s279_s12 = int_to_ptr.hbm [resolvable:$true] %s278_s12 }
  0x2a   : > { %p999_p8 = pnand %p1012_p5, %p1461_p11  ;;  %s295_s3 = scalar_lea.hbm %s1615_s1, %s922_s18 }
  0x2b   : > { %s287_s4 = sand.u32 1, %s1338_s26   ;;  %s268_s8 = scalar_lea.sflag [#allocation3], %s267_s16 }
  0x2c   : > { %1001 = dma.hbm_to_vmem [thread:$0]  (!%p999_p8), %s279_s12, 128, %s281_s30, %s268_s8  }
  0x2d   : > { %s297_s14 = sshll.u32 %s295_s3, 4  ;;  %s291_s25 = scalar_lea.vmem [#allocation5], %s921_s17  ;;  %s298_s14 = int_to_ptr.hbm [resolvable:$true] %s297_s14 }
  0x2e   : > { %s299_s23 = sshll.u32 %s291_s25, 4  ;;  %s288_s19 = scalar_lea.sflag [#allocation6], %s287_s4  ;;  %s300_s23 = int_to_ptr.vmem [resolvable:$true] %s299_s23 }
  0x2f   : > { %1004 = dma.hbm_to_vmem [thread:$0]  (!%p999_p8), %s298_s14, 128, %s300_s23, %s288_s19  }
  0x30   : > { %308 = sbr.rel (%p1426_p3) target bundleno = 1400 (0x578), region = 44  ;;  %s1500_s11 = sand.u32 (!%p1426_p3), 1, %s1322_s22  }
  0x31   : > { %s1503_s2 = sshll.u32 (!%p1426_p3), %s1500_s11, 3  ;;  %s311_s8 = scalar_lea.sflag (!%p1426_p3), [#allocation3], %s1500_s11 }
  0x32   : > { %s314_s3 = scalar_lea.vmem (!%p1426_p3), [#allocation2], %s1503_s2 }
  0x35   : > { %1297 = dma.done.wait (%p1467_p12), %s311_s8, 128  }
  0x36   : > { %1299 = vsyncadd (%p1467_p12), %s311_s8, 4294967168  ;;  %s320_s4 = sand.u32 1, %s1418_s27   ;;  %s324_s25 = scalar_lea.vmem [#allocation5], %s1503_s2 }
  0x37   : > { %s321_s23 = scalar_lea.sflag [#allocation6], %s320_s4 }
  0x38   : > { %1301 = dma.done.wait (%p1467_p12), %s321_s23, 128  }
  0x39   : > { %1303 = vsyncadd (%p1467_p12), %s321_s23, 4294967168 }
  0x3a   : > { %1305 = dma.done.wait (%p61_p1), [#allocation6], 256  }
  0x3b   : > { %1307 = vsyncadd (%p61_p1), [#allocation6], 4294967040 }
  0x3c   : > { %1309 = dma.done.wait (%p61_p1), [#allocation9], 512  }
  0x3d   : > { %1311 = vsyncadd (%p61_p1), [#allocation9], 4294966784  ;;  %v967_v0 = vld [vmem:[#allocation7 + $0x8] sm:$0xff]  ;;  %v969_v1 = vld [vmem:[#allocation8 + $0x8] sm:$0xff]  ;;  %vm395_vm0 = vcmask 261120   ;;  %vm446_vm1 = vcmask 64512  }
  0x3e   : > { %v966_v2 = vld [vmem:[#allocation7] sm:$0xff]  ;;  %v968_v3 = vld [vmem:[#allocation8] sm:$0xff]  ;;  %405 = vmatpush.bf16.msra.mxu0 %v967_v0  ;;  %437 = vmatpush.bf16.msra.mxu1 %v969_v1  ;;  %s1345_s27 = smov 96   ;;  %s1346_s7 = smov 120   ;;  %vm486_vm2 = vcmask 1043456  }
  0x3f   : > { %v375_v4 = vld [vmem:[%s314_s3] sm:$0xff]  ;;  %v377_v5 = vld [vmem:[%s324_s25] sm:$0xff]  ;;  %s1347_s10 = smov 104   ;;  %s1348_s14 = smov 112  }
  0x40   : > { %v376_v6 = vpack.c.bf16 %v375_v4, %v375_v4  ;;  %v378_v7 = vpack.c.bf16 %v377_v5, %v377_v5  ;;  %v504_v19 = vld [vmem:[#allocation10] sm:$0xf]  ;;  %s1349_s16 = smov 88   ;;  %s1350_s17 = smov 80  }
  0x41   : > { %v589_v20 = vsel %vm486_vm2, %v504_v19, 0  ;;  %s1351_s18 = smov 72   ;;  %s963_s20 = sshll.u32 %s1330_s24, 3 }
  0x42   : > { %406 = vmatpush.bf16.msra.mxu0 %v966_v2  ;;  %438 = vmatpush.bf16.msra.mxu1 %v968_v3  ;;  %s778_s30 = scalar_lea.hbm %s1620_s6, %s963_s20  ;;  %s373_s19 = scalar_lea.vmem [#allocation11], %s1503_s2 }
  0x43   : > { %s780_s8 = sshll.u32 %s373_s19, 4  ;;  %s782_s3 = sshll.u32 %s778_s30, 4  ;;  %s781_s8 = int_to_ptr.vmem [resolvable:$true] %s780_s8  ;;  %s783_s3 = int_to_ptr.hbm [resolvable:$true] %s782_s3 }
  0x44   : > { %s767_s24 = scalar_lea.sflag [#allocation4], %s1500_s11  ;;  %s1258_s4 = sshra.s32 %s783_s3, 4  ;;  %s1259_s4 = int_to_ptr.hbm [resolvable:$true] %s1258_s4 }
  0x45   : > { %940 = vmatmul.msk.bf16.vlgmr.msra.gmra.mxu0 %vm395_vm0, %v376_v6  ;;  %949 = vmatmul.msk.bf16.vlgmr.msra.gmra.mxu1 %vm395_vm0, %v378_v7  ;;  %s1260_s23 = scalar_lea.hbm %s1259_s4, 8  ;;  %s1264_s2 = scalar_lea.hbm %s1620_s6, 16 }
  0x46   : > { %p1261_p1 = scmp.ne.s32.totalorder %s1259_s4, %s1260_s23  ;;  %p1265_p10 = scmp.lt.s32.totalorder %s1259_s4, %s1620_s6 }
  0x47   : > { %p1266_p11 = scmp.lt.s32.totalorder %s1264_s2, %s1260_s23 }
  0x48   : > { %p1262_p3 = pnand %p1261_p1, %p1474_p4 }
  0x49   : > { %p1267_p12 = por %p1266_p11, %p1265_p10 }
  0x4a   : > { %p1263_p9 = pneg %p1262_p3 }
  0x4c   : > { %p1268_p13 = pnand %p1267_p12, %p1263_p9 }
  0xc2   : > { %v408_v8 = vpop.f32.mrf.mxu0  ;;  %v440_v9 = vpop.f32.mrf.mxu1 }
  0xc3   : > { %v444_v10 = vpack.c.bf16 %v408_v8, %v408_v8  ;;  %v445_v11 = vpack.c.bf16 %v440_v9, %v440_v9 }
  0xc5   : > { %v506_v12 = vunpack.c.l.b16 %v444_v10  ;;  %v479_v13 = vunpack.c.l.b16 %v445_v11  ;;  %v451_v14 = vsel %vm446_vm1, %v445_v11, 0 }
  0xc6   : > { %460 = vmatpush.bf16.xpose.msra.mxu2 %v451_v14 }
  0xc7   : > { %v507_v15 = vpack.c.b16 %v506_v12, %v506_v12  ;;  %v1528_v16 = vpack.c.b16 %v479_v13, %v479_v13 }
  0xc9   : > { %481 = vrot.lane.b32.xlu1 %v1528_v16, %s1345_s27  ;;  %508 = vrot.lane.b32.xlu2 %v507_v15, %s1346_s7 }
  0xca   : > { %v410_v17 = vpop.f32.mrf.mxu0  ;;  %v442_v18 = vpop.f32.mrf.mxu1 }
  0xcd   : > { %950 = vmatmul.msk.bf16.vlgmr.msra.gmra.mxu2 %vm446_vm1, %v444_v10 }
  0xce   : > { %598 = vmatpush.bf16.msrb.mxu2 %v589_v20 }
  0xd1   : > { %510 = vrot.lane.b32.xlu1 %v1528_v16, %s1346_s7  ;;  %684 = vrot.lane.b32.xlu2 %v1528_v16, %s1347_s10 }
  0xd9   : > { %682 = vrot.lane.b32.xlu1 %v507_v15, %s1347_s10  ;;  %604 = vrot.lane.b32.xlu2 %v507_v15, %s1348_s14 }
 0x123   : > { %v509_v21 = vpop.permute.xlu2 %508 }
 0x12b   : > { %v685_v22 = vpop.permute.xlu2 %684 }
 0x12c   : > { %v690_v23 = vsel %vm446_vm1, %v685_v22, 0  ;;  %v565_v22 = vld [vmem:[#allocation10 + $0x4] sm:$0xf] }
 0x12d   : > { %699 = vmatpush.bf16.xpose.msra.mxu2 %v690_v23  ;;  %v570_v23 = vsel %vm486_vm2, %v565_v22, 0 }
 0x12e   : > { %579 = vmatpush.bf16.msrb.mxu1 %v570_v23 }
 0x133   : > { %v605_v42 = vpop.permute.xlu2 %604 }
 0x13b   : > { %v482_v24 = vpop.permute.xlu1 %481 }
 0x13c   : > { %v488_v25 = vsel %vm486_vm2, %v482_v24, 0  ;;  %v661_v24 = vld [vmem:[#allocation10 + $0x8] sm:$0xf] }
 0x13d   : > { %497 = vmatpush.bf16.msra.mxu3 %v488_v25 }
 0x143   : > { %v511_v26 = vpop.permute.xlu1 %510 }
 0x144   : > { %v516_v27 = vsel %vm446_vm1, %v511_v26, 0  ;;  %v666_v26 = vsel %vm486_vm2, %v661_v24, 0 }
 0x145   : > { %525 = vmatpush.bf16.xpose.msrb.mxu3 %v516_v27  ;;  %675 = vmatpush.bf16.msra.mxu1 %v666_v26 }
 0x14b   : > { %v683_v48 = vpop.permute.xlu1 %682 }
 0x150   : > { %v462_v28 = vpop.f32.mrf.mxu2 }
 0x151   : > { %v466_v29 = vsel %vm446_vm1, %v462_v28, -inf }
 0x152   : > { %467 = vmax.xlane.f32.xlu0 %v466_v29 }
 0x158   : > { %v464_v30 = vpop.f32.mrf.mxu2 }
 0x1c5   : > { %v468_v31 = vpop.xlane.xlu0 %467 }
 0x1c6   : > { %v469_v32 = vsub.f32 %v462_v28, %v468_v31 }
 0x1c8   : > { %v470_v33 = vmul.f32 1.442695, %v469_v32 }
 0x1ca   : > { %1078 = vpow2.f32 %v470_v33 }
 0x1d0   : > { %v1079_v34 = vpop.eup %1078 }
 0x1d1   : > { %v472_v35 = vsel %vm446_vm1, %v1079_v34, 0.0 }
 0x1d2   : > { %473 = vadd.xlane.f32.xlu0 %v472_v35 }
 0x1e6   : > { %606 = vrot.lane.b32.xlu0 %v1528_v16, %s1348_s14 }
 0x245   : > { %v474_v36 = vpop.xlane.xlu0 %473 }
 0x246   : > { %1080 = vrcp.f32 %v474_v36 }
 0x24c   : > { %v1081_v37 = vpop.eup %1080 }
 0x24d   : > { %v476_v38 = vmul.f32 %v1081_v37, %v1079_v34  ;;  %v739_v37 = vld [vmem:[#allocation10 + $0xc] sm:$0xf] }
 0x24f   : > { %v477_v39 = vpack.c.bf16 %v476_v38, %v476_v38  ;;  %v744_v38 = vsel %vm486_vm2, %v739_v37, 0 }
 0x251   : > { %951 = vmatmul.msk.bf16.vlgmr.msra.gmra.mxu3 %vm446_vm1, %v477_v39 }
 0x258   : > { %v607_v40 = vpop.permute.xlu0 %606 }
 0x259   : > { %v612_v41 = vsel %vm446_vm1, %v607_v40, 0 }
 0x25a   : > { %621 = vmatpush.bf16.xpose.msra.mxu3 %v612_v41 }
 0x261   : > { %952 = vmatmul.msk.bf16.vlgmr.msrb.gmra.mxu3 %vm446_vm1, %v509_v21 }
 0x271   : > { %956 = vmatmul.msk.bf16.vlgmr.msra.gmra.mxu3 %vm446_vm1, %v605_v42 }
 0x2d4   : > { %v499_v43 = vpop.f32.mrf.mxu3 }
 0x2d5   : > { %v503_v44 = vpack.c.bf16 %v499_v43, %v499_v43 }
 0x2d7   : > { %955 = vmatmul.msk.bf16.vlgmr.msrb.gmra.mxu2 %vm446_vm1, %v503_v44 }
 0x2dc   : > { %v501_v45 = vpop.f32.mrf.mxu3 }
 0x2e4   : > { %v527_v46 = vpop.f32.mrf.mxu3 }
 0x2e5   : > { %v531_v47 = vsel %vm446_vm1, %v527_v46, -inf }
 0x2e6   : > { %532 = vmax.xlane.f32.xlu1 %v531_v47 }
 0x2e7   : > { %959 = vmatmul.msk.bf16.vlgmr.msra.gmra.mxu2 %vm446_vm1, %v683_v48  ;;  %v1077_v48 = vld [vmem:[%s1619_s5] ss:$0 sm:$0xff] }
 0x2ec   : > { %v529_v49 = vpop.f32.mrf.mxu3 }
 0x2f4   : > { %v623_v50 = vpop.f32.mrf.mxu3 }
 0x2f5   : > { %v627_v51 = vsel %vm446_vm1, %v623_v50, -inf }
 0x2f6   : > { %628 = vmax.xlane.f32.xlu0 %v627_v51 }
 0x2fc   : > { %v625_v52 = vpop.f32.mrf.mxu3 }
 0x2ff   : > { %543 = vrot.lane.b32.xlu1 %v1528_v16, %s1349_s16 }
 0x359   : > { %v533_v54 = vpop.xlane.xlu1 %532 }
 0x35a   : > { %v1550_v53 = vpop.f32.mrf.mxu2  ;;  %v534_v55 = vsub.f32 %v527_v46, %v533_v54 }
 0x35c   : > { %v535_v57 = vmul.f32 1.442695, %v534_v55 }
 0x35e   : > { %1082 = vpow2.f32 %v535_v57 }
 0x362   : > { %v602_v56 = vpop.f32.mrf.mxu2 }
 0x364   : > { %v1083_v63 = vpop.eup %1082 }
 0x365   : > { %v537_v3 = vsel %vm446_vm1, %v1083_v63, 0.0 }
 0x369   : > { %v629_v58 = vpop.xlane.xlu0 %628 }
 0x36a   : > { %v630_v59 = vsub.f32 %v623_v50, %v629_v58  ;;  %v701_v60 = vpop.f32.mrf.mxu2 }
 0x36b   : > { %v705_v61 = vsel %vm446_vm1, %v701_v60, -inf }
 0x36c   : > { %v631_v62 = vmul.f32 1.442695, %v630_v59  ;;  %706 = vmax.xlane.f32.xlu2 %v705_v61 }
 0x36e   : > { %1084 = vpow2.f32 %v631_v62 }
 0x371   : > { %v544_v0 = vpop.permute.xlu1 %543 }
 0x372   : > { %v703_v1 = vpop.f32.mrf.mxu2  ;;  %v549_v2 = vsel %vm486_vm2, %v544_v0, 0 }
 0x373   : > { %558 = vmatpush.bf16.msrb.mxu0 %v549_v2 }
 0x374   : > { %v1085_v4 = vpop.eup %1084  ;;  %538 = vadd.xlane.f32.xlu2 %v537_v3 }
 0x375   : > { %v633_v5 = vsel %vm446_vm1, %v1085_v4, 0.0 }
 0x376   : > { %634 = vadd.xlane.f32.xlu0 %v633_v5 }
 0x38a   : > { %639 = vrot.lane.b32.xlu0 %v1528_v16, %s1350_s17 }
 0x3df   : > { %v707_v6 = vpop.xlane.xlu2 %706 }
 0x3e0   : > { %v708_v7 = vsub.f32 %v701_v60, %v707_v6 }
 0x3e2   : > { %v709_v8 = vmul.f32 1.442695, %v708_v7 }
 0x3e4   : > { %1086 = vpow2.f32 %v709_v8 }
 0x3e7   : > { %v539_v9 = vpop.xlane.xlu2 %538 }
 0x3e8   : > { %1088 = vrcp.f32 %v539_v9 }
 0x3e9   : > { %v635_v14 = vpop.xlane.xlu0 %634 }
 0x3ea   : > { %v1087_v10 = vpop.eup %1086  ;;  %1090 = vrcp.f32 %v635_v14 }
 0x3eb   : > { %v711_v11 = vsel %vm446_vm1, %v1087_v10, 0.0 }
 0x3ec   : > { %712 = vadd.xlane.f32.xlu2 %v711_v11 }
 0x3ee   : > { %v1089_v12 = vpop.eup %1088 }
 0x3ef   : > { %v541_v13 = vmul.f32 %v1089_v12, %v1083_v63 }
 0x3f0   : > { %v1091_v17 = vpop.eup %1090 }
 0x3f1   : > { %v542_v15 = vpack.c.bf16 %v541_v13, %v541_v13  ;;  %v637_v19 = vmul.f32 %v1091_v17, %v1085_v4 }
 0x3f3   : > { %953 = vmatmul.msk.bf16.vlgmr.msrb.gmra.mxu0 %vm446_vm1, %v542_v15  ;;  %v638_v21 = vpack.c.bf16 %v637_v19, %v637_v19 }
 0x3fc   : > { %v640_v18 = vpop.permute.xlu0 %639 }
 0x3fd   : > { %v645_v20 = vsel %vm486_vm2, %v640_v18, 0 }
 0x3fe   : > { %654 = vmatpush.bf16.msra.mxu0 %v645_v20 }
 0x402   : > { %753 = vmatpush.bf16.msrb.mxu0 %v744_v38 }
 0x403   : > { %957 = vmatmul.msk.bf16.vlgmr.msra.gmra.mxu0 %vm446_vm1, %v638_v21 }
 0x404   : > { %717 = vrot.lane.b32.xlu2 %v1528_v16, %s1351_s18 }
 0x45f   : > { %v713_v25 = vpop.xlane.xlu2 %712 }
 0x460   : > { %1092 = vrcp.f32 %v713_v25 }
 0x466   : > { %v1093_v27 = vpop.eup %1092 }
 0x467   : > { %v715_v28 = vmul.f32 %v1093_v27, %v1087_v10  ;;  %v718_v29 = vpop.permute.xlu2 %717 }
 0x468   : > { %v723_v30 = vsel %vm486_vm2, %v718_v29, 0 }
 0x469   : > { %v716_v31 = vpack.c.bf16 %v715_v28, %v715_v28  ;;  %732 = vmatpush.bf16.msrb.mxu3 %v723_v30 }
 0x46c   : > { %960 = vmatmul.msk.bf16.vlgmr.msrb.gmra.mxu3 %vm446_vm1, %v716_v31 }
 0x470   : > { %v560_v16 = vpop.f32.mrf.mxu0 }
 0x471   : > { %v564_v32 = vpack.c.bf16 %v560_v16, %v560_v16 }
 0x473   : > { %954 = vmatmul.msk.bf16.vlgmr.msrb.gmra.mxu1 %vm446_vm1, %v564_v32 }
 0x478   : > { %v562_v33 = vpop.f32.mrf.mxu0 }
 0x480   : > { %v656_v34 = vpop.f32.mrf.mxu0 }
 0x481   : > { %v660_v35 = vpack.c.bf16 %v656_v34, %v656_v34 }
 0x483   : > { %958 = vmatmul.msk.bf16.vlgmr.msra.gmra.mxu1 %vm446_vm1, %v660_v35 }
 0x488   : > { %v658_v36 = vpop.f32.mrf.mxu0 }
 0x4ef   : > { %v734_v39 = vpop.f32.mrf.mxu3 }
 0x4f0   : > { %v738_v40 = vpack.c.bf16 %v734_v39, %v734_v39  ;;  %v581_v41 = vpop.f32.mrf.mxu1 }
 0x4f1   : > { %v601_v44 = vadd.f32 %v1550_v53, %v581_v41 }
 0x4f2   : > { %961 = vmatmul.msk.bf16.vlgmr.msrb.gmra.mxu0 %vm446_vm1, %v738_v40 }
 0x4f7   : > { %v736_v42 = vpop.f32.mrf.mxu3 }
 0x4f8   : > { %v583_v43 = vpop.f32.mrf.mxu1 }
 0x500   : > { %v677_v45 = vpop.f32.mrf.mxu1 }
 0x501   : > { %v681_v46 = vadd.f32 %v677_v45, %v601_v44 }
 0x508   : > { %v679_v47 = vpop.f32.mrf.mxu1 }
 0x56f   : > { %v755_v49 = vpop.f32.mrf.mxu0 }
 0x570   : > { %v759_v50 = vadd.f32 %v755_v49, %v681_v46 }
 0x572   : > { %v764_v51 = vadd.f32 %v1077_v48, %v759_v50 }
 0x574   : > { %765 = vst.msk [vmem:[%s373_s19] sm:$0xff] %vm395_vm0, %v764_v51 }
 0x575   : > { %1271 = shalt.err (!%p1268_p13)
}
 0x576   : > { %986 = dma.vmem_to_hbm [thread:$0]  (%p1474_p4), %s781_s8, 128, %s783_s3, %s767_s24  }
 0x577   : > { %v757_v52 = vpop.f32.mrf.mxu0 }
 0x578 PF: > { %s794_s11 = sand.u32 1, %s1318_s21   ;;  %p1006_p0 = pnand %p920_p6, %p1482_p7 }
 0x579   : > { %s795_s14 = scalar_lea.sflag [#allocation4], %s794_s11 }
 0x57a   : > { %p1007_p2 = pneg %p1006_p0 }
 0x57c   : > { %1313 = dma.done.wait (%p1007_p2), %s795_s14, 128  }
 0x57d   : > { %1315 = vsyncadd (%p1007_p2), %s795_s14, 4294967168  ;;  %s26_s26 = sadd.s32 1, %s1338_s26   ;;  %s1640_s16 = sld [smem:[#allocation17_spill]] }
 0x57e   : > { %p23_p5 = scmp.ge.s32.totalorder %s26_s26, 4   ;;  %s1641_s23 = sld [smem:[#allocation20_spill]] }
 0x57f   : > { %s1642_s24 = sld [smem:[#allocation18_spill]]  ;;  %s1644_s21 = smov %s1322_s22 }
 0x580   : > { %s1643_s25 = sld [smem:[#allocation19_spill]]  ;;  %25 = sbr.rel (!%p23_p5) target bundleno = 13 (0xd), region = 114 }
 0x583   : > { %s1645_s22 = smov %s1640_s16 }
 0x585   :  { %801 = vsyncpa [#allocation3], 1 }
 0x586   :  { %803 = vsyncpa [#allocation3 + $0x1], 1 }
 0x587   :  { %804 = vsyncpa [#allocation6], 1 }
 0x588   :  { %806 = vsyncpa [#allocation6 + $0x1], 1 }
 0x589   :  { %807 = vsyncpa [#allocation9], 1 }
 0x58a   :  { %808 = vsyncpa [#allocation4], 1 }
 0x58b   :  { %810 = vsyncpa [#allocation4 + $0x1], 1 }

</bundles_post_ra>
